<compile_context>
chip_gen: v7x
topology: tpu7x:2x2x1
jax: 0.10.0
libtpu: 0.0.40
codegen_flags: <defaults>
</compile_context>

<pallas_src>
import jax
import jax.numpy as jnp
from jax.experimental import pallas as pl
from jax.experimental.pallas import tpu as pltpu

IN_F = 3        # fc1 input features
IN_PAD = 8      # input rows padded to one f32 sublane tile (row 3 = 1.0 bias row)
HID = 24        # hidden width
OUT_F = 4       # fc3 output features (stored un-padded)
OUT_PAD = 8     # padded rows for the last matmul's W3 slab
LANE = 128
TB_MAX = 32768  # max batch tile (lane axis); multiple of 128


def mlp_kernel(x_ref, w1_ref, w2_ref, w3_ref, b2_ref, b3_ref, o_ref):
    # x_ref  : (IN_PAD, tb)   rows 0..2 = features, row 3 = 1.0 (bias row), rest 0
    # w1_ref : (HID, IN_PAD)  cols 0..2 = W1, col 3 = b1, rest 0
    # w2_ref : (HID, HID)
    # w3_ref : (OUT_PAD, HID) rows 0..3 = W3, rest 0
    # b2_ref : (HID, 1)
    # b3_ref : (OUT_PAD, 1)   rows 0..3 = b3, rest 0
    # o_ref  : (OUT_F, tb)
    x = x_ref[...]                                                     # (8, tb)

    # fc1 (+ folded bias) + ReLU
    h1 = jnp.dot(w1_ref[...], x, preferred_element_type=jnp.float32)   # (24, tb)
    h1 = jnp.maximum(h1, 0.0)

    # fc2 + ReLU
    h2 = jnp.dot(w2_ref[...], h1, preferred_element_type=jnp.float32) + b2_ref[...]
    h2 = jnp.maximum(h2, 0.0)                                           # (24, tb)

    # fc3
    out = jnp.dot(w3_ref[...], h2, preferred_element_type=jnp.float32) + b3_ref[...]
    o_ref[...] = out[:OUT_F, :].astype(o_ref.dtype)                     # (4, tb)


def pack_params(w1, b1, w2, b2, w3, b3):
    """Pack PyTorch-layout (out, in) weights into padded, VMEM-resident slabs.
    Called once at parameter-load time (hoisted out of the per-call path)."""
    w1s = jnp.zeros((HID, IN_PAD), jnp.float32)
    w1s = w1s.at[:, :IN_F].set(w1.astype(jnp.float32))
    w1s = w1s.at[:, IN_F].set(b1.astype(jnp.float32))        # bias folded into col 3

    w2s = w2.astype(jnp.float32)                              # (24, 24)
    b2s = b2.astype(jnp.float32).reshape(HID, 1)

    w3s = jnp.zeros((OUT_PAD, HID), jnp.float32).at[:OUT_F, :].set(w3.astype(jnp.float32))
    b3s = jnp.zeros((OUT_PAD, 1), jnp.float32).at[:OUT_F, 0].set(b3.astype(jnp.float32))
    return w1s, w2s, w3s, b2s, b3s


@jax.jit
def mlp_forward(x, w1s, w2s, w3s, b2s, b3s):
    """x: (B, 3).  Packed params from pack_params.  Returns (B, 4)."""
    B = x.shape[0]

    # Static (trace-time) batch tiling.
    b_pad128 = max(LANE, -(-B // LANE) * LANE)
    if b_pad128 >= 2 * LANE:
        # Keep >= 2 grid blocks (v7x has 2 TensorCores), cap tile at TB_MAX.
        half = -(-(b_pad128 // 2) // LANE) * LANE
        tb = min(TB_MAX, half)
    else:
        tb = b_pad128
    grid_n = -(-b_pad128 // tb)
    b_pad = grid_n * tb

    # Transposed, padded input slab: (8, B_pad), batch on the lane axis.
    xf = x.astype(jnp.float32)                                # mirrors x.to(torch.float)
    x_t = jnp.zeros((IN_PAD, b_pad), jnp.float32)
    x_t = x_t.at[:IN_F, :B].set(xf.T)
    x_t = x_t.at[IN_F, :].set(1.0)                            # bias row for folded b1

    out_t = pl.pallas_call(
        mlp_kernel,
        out_shape=jax.ShapeDtypeStruct((OUT_F, b_pad), jnp.float32),
        grid=(grid_n,),
        in_specs=[
            pl.BlockSpec((IN_PAD, tb), lambda i: (0, i)),      # x tile (pipelined)
            pl.BlockSpec((HID, IN_PAD), lambda i: (0, 0)),     # W1 slab, resident
            pl.BlockSpec((HID, HID), lambda i: (0, 0)),        # W2, resident
            pl.BlockSpec((OUT_PAD, HID), lambda i: (0, 0)),    # W3 slab, resident
            pl.BlockSpec((HID, 1), lambda i: (0, 0)),          # b2, resident
            pl.BlockSpec((OUT_PAD, 1), lambda i: (0, 0)),      # b3 slab, resident
        ],
        out_specs=pl.BlockSpec((OUT_F, tb), lambda i: (0, i)),
        compiler_params=pltpu.CompilerParams(
            dimension_semantics=("parallel",)),
    )(x_t, w1s, w2s, w3s, b2s, b3s)

    # Strip batch padding and transpose back to (B, 4) (fuses under jit).
    return out_t[:, :B].T


def init_linear(key, fan_in, fan_out):
    # PyTorch nn.Linear default init: U(-1/sqrt(fan_in), 1/sqrt(fan_in)),
    # weights stored in PyTorch layout (out_features, in_features).
    kw, kb = jax.random.split(key)
    bound = 1.0 / jnp.sqrt(float(fan_in))
    w = jax.random.uniform(kw, (fan_out, fan_in), jnp.float32, -bound, bound)
    b = jax.random.uniform(kb, (fan_out,), jnp.float32, -bound, bound)
    return w, b


if __name__ == "__main__":
    key = jax.random.PRNGKey(0)
    kx, k1, k2, k3 = jax.random.split(key, 4)

    # Parameters matching Net.__init__ shapes.
    w1, b1 = init_linear(k1, IN_F, HID)   # fc1: (24, 3), (24,)
    w2, b2 = init_linear(k2, HID, HID)    # fc2: (24, 24), (24,)
    w3, b3 = init_linear(k3, HID, OUT_F)  # fc3: (4, 24), (4,)

    packed = pack_params(w1, b1, w2, b2, w3, b3)   # one-time packing

    # Example input: batch of 8 feature vectors of size 3.
    x = jax.random.normal(kx, (8, IN_F), jnp.float32)

    out = mlp_forward(x, *packed)
    out = jax.block_until_ready(out)

    # Reference check in plain JAX (PyTorch semantics: x @ W.T + b).
    ref = jnp.maximum(x @ w1.T + b1, 0.0)
    ref = jnp.maximum(ref @ w2.T + b2, 0.0)
    ref = ref @ w3.T + b3

    assert out.shape == (8, OUT_F)
    assert jnp.allclose(out, ref, atol=1e-5, rtol=1e-5)

    print("KERNEL_OK")
</pallas_src>

<mosaic_0001>
module attributes {stable_mosaic.version = 11 : i64} {
  func.func @mlp_kernel(%arg0: i32, %arg1: memref<8x128xf32, #tpu.memory_space<vmem>>, %arg2: memref<24x8xf32, #tpu.memory_space<vmem>>, %arg3: memref<24x24xf32, #tpu.memory_space<vmem>>, %arg4: memref<8x24xf32, #tpu.memory_space<vmem>>, %arg5: memref<24x1xf32, #tpu.memory_space<vmem>>, %arg6: memref<8x1xf32, #tpu.memory_space<vmem>>, %arg7: memref<4x128xf32, #tpu.memory_space<vmem>>) attributes {dimension_semantics = [#tpu.dimension_semantics<parallel>], iteration_bounds = array<i64: 1>, scalar_prefetch = 0 : i64, scratch_operands = 0 : i64, tpu.core_type = #tpu.core_type<tc>, window_params = [{transform_indices = @transform_0, window_bounds = array<i64: 8, 128>}, {pipeline_mode = #tpu.pipeline_mode<synchronous>, transform_indices = @transform_1, window_bounds = array<i64: 24, 8>}, {pipeline_mode = #tpu.pipeline_mode<synchronous>, transform_indices = @transform_2, window_bounds = array<i64: 24, 24>}, {pipeline_mode = #tpu.pipeline_mode<synchronous>, transform_indices = @transform_3, window_bounds = array<i64: 8, 24>}, {pipeline_mode = #tpu.pipeline_mode<synchronous>, transform_indices = @transform_4, window_bounds = array<i64: 24, 1>}, {pipeline_mode = #tpu.pipeline_mode<synchronous>, transform_indices = @transform_5, window_bounds = array<i64: 8, 1>}, {transform_indices = @transform_6, window_bounds = array<i64: 4, 128>}]} {
    %c0 = arith.constant 0 : index
    %c0_0 = arith.constant 0 : index
    %0 = vector.load %arg1[%c0, %c0_0] : memref<8x128xf32, #tpu.memory_space<vmem>>, vector<8x128xf32>
    %c0_1 = arith.constant 0 : index
    %c0_2 = arith.constant 0 : index
    %1 = vector.load %arg2[%c0_1, %c0_2] : memref<24x8xf32, #tpu.memory_space<vmem>>, vector<24x8xf32>
    %cst = arith.constant dense<0.000000e+00> : vector<24x128xf32>
    %2 = tpu.matmul %1, %0, %cst {dimension_numbers = #tpu.dot_dimension_numbers<[1], [0], [0], [1], [0, 0, 1, 1], [], []>} : vector<24x8xf32>, vector<8x128xf32>, vector<24x128xf32> -> vector<24x128xf32>
    %cst_3 = arith.constant 0.000000e+00 : f32
    %3 = vector.broadcast %cst_3 : f32 to vector<24x128xf32>
    %4 = arith.maximumf %2, %3 : vector<24x128xf32>
    %c0_4 = arith.constant 0 : index
    %c0_5 = arith.constant 0 : index
    %5 = vector.load %arg3[%c0_4, %c0_5] : memref<24x24xf32, #tpu.memory_space<vmem>>, vector<24x24xf32>
    %cst_6 = arith.constant dense<0.000000e+00> : vector<24x128xf32>
    %6 = tpu.matmul %5, %4, %cst_6 {dimension_numbers = #tpu.dot_dimension_numbers<[1], [0], [0], [1], [0, 0, 1, 1], [], []>} : vector<24x24xf32>, vector<24x128xf32>, vector<24x128xf32> -> vector<24x128xf32>
    %c0_7 = arith.constant 0 : index
    %c0_8 = arith.constant 0 : index
    %7 = vector.load %arg5[%c0_7, %c0_8] : memref<24x1xf32, #tpu.memory_space<vmem>>, vector<24x1xf32>
    %8 = vector.broadcast %7 : vector<24x1xf32> to vector<24x128xf32>
    %9 = arith.addf %6, %8 : vector<24x128xf32>
    %cst_9 = arith.constant 0.000000e+00 : f32
    %10 = vector.broadcast %cst_9 : f32 to vector<24x128xf32>
    %11 = arith.maximumf %9, %10 : vector<24x128xf32>
    %c0_10 = arith.constant 0 : index
    %c0_11 = arith.constant 0 : index
    %12 = vector.load %arg4[%c0_10, %c0_11] : memref<8x24xf32, #tpu.memory_space<vmem>>, vector<8x24xf32>
    %cst_12 = arith.constant dense<0.000000e+00> : vector<8x128xf32>
    %13 = tpu.matmul %12, %11, %cst_12 {dimension_numbers = #tpu.dot_dimension_numbers<[1], [0], [0], [1], [0, 0, 1, 1], [], []>} : vector<8x24xf32>, vector<24x128xf32>, vector<8x128xf32> -> vector<8x128xf32>
    %c0_13 = arith.constant 0 : index
    %c0_14 = arith.constant 0 : index
    %14 = vector.load %arg6[%c0_13, %c0_14] : memref<8x1xf32, #tpu.memory_space<vmem>>, vector<8x1xf32>
    %15 = vector.broadcast %14 : vector<8x1xf32> to vector<8x128xf32>
    %16 = arith.addf %13, %15 : vector<8x128xf32>
    %17 = vector.extract_strided_slice %16 {offsets = [0, 0], sizes = [4, 128], strides = [1, 1]} : vector<8x128xf32> to vector<4x128xf32>
    %c0_15 = arith.constant 0 : index
    %c0_16 = arith.constant 0 : index
    %18 = vector.load %arg7[%c0_15, %c0_16] : memref<4x128xf32, #tpu.memory_space<vmem>>, vector<4x128xf32>
    tpu.vector_store %arg7[%c0_15, %c0_16], %17 {strides = array<i32>} : memref<4x128xf32, #tpu.memory_space<vmem>>, vector<4x128xf32>,
    return
  }
  func.func @transform_0(%arg0: i32) -> (i32, i32) {
    %c0_i32 = arith.constant 0 : i32
    %c0_i32_0 = arith.constant 0 : i32
    return %c0_i32, %arg0 : i32, i32
  }
  func.func @transform_1(%arg0: i32) -> (i32, i32) {
    %c0_i32 = arith.constant 0 : i32
    %c0_i32_0 = arith.constant 0 : i32
    %c0_i32_1 = arith.constant 0 : i32
    return %c0_i32, %c0_i32_0 : i32, i32
  }
  func.func @transform_2(%arg0: i32) -> (i32, i32) {
    %c0_i32 = arith.constant 0 : i32
    %c0_i32_0 = arith.constant 0 : i32
    %c0_i32_1 = arith.constant 0 : i32
    return %c0_i32, %c0_i32_0 : i32, i32
  }
  func.func @transform_3(%arg0: i32) -> (i32, i32) {
    %c0_i32 = arith.constant 0 : i32
    %c0_i32_0 = arith.constant 0 : i32
    %c0_i32_1 = arith.constant 0 : i32
    return %c0_i32, %c0_i32_0 : i32, i32
  }
  func.func @transform_4(%arg0: i32) -> (i32, i32) {
    %c0_i32 = arith.constant 0 : i32
    %c0_i32_0 = arith.constant 0 : i32
    %c0_i32_1 = arith.constant 0 : i32
    return %c0_i32, %c0_i32_0 : i32, i32
  }
  func.func @transform_5(%arg0: i32) -> (i32, i32) {
    %c0_i32 = arith.constant 0 : i32
    %c0_i32_0 = arith.constant 0 : i32
    %c0_i32_1 = arith.constant 0 : i32
    return %c0_i32, %c0_i32_0 : i32, i32
  }
  func.func @transform_6(%arg0: i32) -> (i32, i32) {
    %c0_i32 = arith.constant 0 : i32
    %c0_i32_0 = arith.constant 0 : i32
    return %c0_i32, %arg0 : i32, i32
  }
}

</mosaic_0001>

<bundles_post_ra>
// kernel: mlp_forward.1
= control target key start
LH: loop header
LB: loop body
LE: loop exit
PB: predicated region body
PF: predicated region fallthrough
CT: control target
= control target key end

     0   :  { %vm27_vm0 = vcmask 64512   ;;  %v387_v0 = vmov 0.0   ;;  %vm388_vm1 = vmmov 0   ;;  %v389_v5 = vmov 0.0|0.0   ;;  %s486_s0 = inlined_call_operand.vmem [shape: f32[8,128], index: 0, kind: input, shape index: {}]   ;;  %s487_s1 = inlined_call_operand.vmem [shape: f32[24,8], index: 1, kind: input, shape index: {}]   ;;  %s488_s4 = inlined_call_operand.vmem [shape: f32[24,1], index: 4, kind: input, shape index: {}]   ;;  %s489_s5 = inlined_call_operand.vmem [shape: f32[8,1], index: 5, kind: input, shape index: {}]   ;;  %s490_s2 = inlined_call_operand.vmem [shape: f32[24,24], index: 2, kind: input, shape index: {}]   ;;  %s491_s3 = inlined_call_operand.vmem [shape: f32[8,24], index: 3, kind: input, shape index: {}]   ;;  %s492_s6 = inlined_call_operand.vmem [shape: f32[4,128], index: 6, kind: output, shape index: {}]  }
   0x1   :  { %340 = vmatprep.subr.mxu0 %v387_v0  ;;  %v23_v1 = vld [vmem:[%s486_s0] sm:$0xff]  ;;  %342 = vmatprep.mubr.msk.f32.mxu0 %vm388_vm1, %v387_v0  ;;  %v25_v3 = vld [vmem:[%s487_s1 + $0x8] sm:$0xff]  ;;  %v26_v4 = vld [vmem:[%s487_s1 + $0x10] sm:$0xff]  ;;  %v390_v6 = vmov 0   ;;  %vm141_vm2 = vcmask 195584  }
   0x2   :  { %v24_v2 = vld [vmem:[%s487_s1] sm:$0xff]  ;;  %341 = vmatpush3.msra.mxu0 %v23_v1  ;;  %357 = vmatprep.mubr.msk.f32.mxu1 %vm388_vm1, %v387_v0  ;;  %v125_v8 = vld [vmem:[%s488_s4 + $0x10] sm:$0xff]  ;;  %v124_v9 = vld [vmem:[%s488_s4 + $0x8] sm:$0xff] }
   0x3   :  { %343 = vmatmul.mubr.msk.f32.vlgmr.msra.gmra.mrb[0].mxu0 %vm27_vm0, %v24_v2  ;;  %375 = vmatprep.subr.bf16.mxu1 %v389_v5  ;;  %v123_v7 = vld [vmem:[%s488_s4] sm:$0xff]  ;;  %v121_v22 = vld [vmem:[%s490_s2 + $0x8] sm:$0xff]  ;;  %v122_v23 = vld [vmem:[%s490_s2 + $0x10] sm:$0xff] }
   0x4   :  { %345 = vmatprep.mubr.msk.f32.mxu0 %vm388_vm1, %v387_v0  ;;  %378 = vmatprep.subr.bf16.mxu0 %v389_v5  ;;  %v235_v10 = vld [vmem:[%s489_s5] sm:$0xff] }
   0x5   :  { %385 = vset.pattern.permute.xlu0 %v390_v6  ;;  %386 = vset.pattern.permute.xlu1 %v390_v6  ;;  %v120_v21 = vld [vmem:[%s490_s2] sm:$0xff] }
   0x6   :  { %128 = vperm.xlu0 %385, %v123_v7   ;;  %138 = vperm.xlu1 %386, %v125_v8   ;;  %v234_v40 = vld [vmem:[%s491_s3] sm:$0xff] }
   0x7   :  { %346 = vmatmul.mubr.msk.f32.gmra.mrb[2].mxu0 %vm27_vm0, %v25_v3 }
   0x8   :  { %348 = vmatprep.mubr.msk.f32.mxu0 %vm388_vm1, %v387_v0 }
   0xa   :  { %133 = vperm.xlu0 %385, %v124_v9   ;;  %238 = vperm.xlu1 %386, %v235_v10  }
   0xb   :  { %349 = vmatmul.mubr.msk.f32.gmra.mrb[4].mxu0 %vm27_vm0, %v26_v4 }
   0xc   :  { %372 = vmatprep.mubr.msk.f32.mxu0 %vm388_vm1, %v387_v0 }
  0x85   :  { %v129_v24 = vpop.permute.xlu0 %128  ;;  %v139_v34 = vpop.permute.xlu1 %138 }
  0x89   :  { %v134_v28 = vpop.permute.xlu0 %133  ;;  %v239_v41 = vpop.permute.xlu1 %238 }
  0xd6   :  { %v103_v11 = vpop.f32.mrb[0].mxu0 }
  0xd7   :  { %v344_v12 = vpop.f32.mrb[1].mxu0  ;;  %v117_v14 = vmax.f32 %v103_v11, 0.0 }
  0xda   :  { %v108_v13 = vpop.f32.mrb[2].mxu0 }
  0xdb   :  { %v118_v15 = vmax.f32 %v108_v13, 0.0  ;;  %v347_v16 = vpop.f32.mrb[3].mxu0 }
  0xdd   :  { %v376_v17 = vpack.c.bf16 %v118_v15, %v117_v14 }
  0xde   :  { %v113_v18 = vpop.f32.mrb[4].mxu0 }
  0xdf   :  { %v119_v19 = vmax.f32 %v113_v18, 0.0  ;;  %377 = vmatpush3.bf16.msra.mxu1 %v376_v17  ;;  %v350_v20 = vpop.f32.mrb[5].mxu0 }
  0xe0   :  { %355 = vmatprep.subr.mxu1 %v387_v0 }
  0xe3   :  { %356 = vmatpush3.msra.mxu1 %v119_v19 }
  0xe4   :  { %358 = vmatmul.mubr.msk.f32.vlgmr.msra.gmra.mrb[0].mxu1 %vm141_vm2, %v120_v21 }
  0xe5   :  { %360 = vmatprep.mubr.msk.f32.mxu1 %vm388_vm1, %v387_v0 }
  0xe8   :  { %361 = vmatmul.mubr.msk.f32.gmra.mrb[2].mxu1 %vm141_vm2, %v121_v22 }
  0xe9   :  { %363 = vmatprep.mubr.msk.f32.mxu1 %vm388_vm1, %v387_v0 }
  0xec   :  { %364 = vmatmul.mubr.msk.f32.gmra.mrb[4].mxu1 %vm141_vm2, %v122_v23 }
 0x1b7   :  { %v217_v25 = vpop.f32.mrb[0].mxu1 }
 0x1b8   :  { %v359_v26 = vpop.f32.mrb[1].mxu1  ;;  %v218_v27 = vadd.f32 %v217_v25, %v129_v24 }
 0x1ba   :  { %v231_v32 = vmax.f32 %v218_v27, 0.0 }
 0x1bb   :  { %v222_v29 = vpop.f32.mrb[2].mxu1 }
 0x1bc   :  { %v223_v30 = vadd.f32 %v222_v29, %v134_v28  ;;  %v362_v31 = vpop.f32.mrb[3].mxu1 }
 0x1be   :  { %v232_v33 = vmax.f32 %v223_v30, 0.0 }
 0x1bf   :  { %v227_v35 = vpop.f32.mrb[4].mxu1 }
 0x1c0   :  { %v379_v36 = vpack.c.bf16 %v232_v33, %v231_v32  ;;  %v228_v37 = vadd.f32 %v227_v35, %v139_v34  ;;  %v365_v38 = vpop.f32.mrb[5].mxu1 }
 0x1c2   :  { %v233_v39 = vmax.f32 %v228_v37, 0.0  ;;  %380 = vmatpush3.bf16.msra.mxu0 %v379_v36 }
 0x1c3   :  { %370 = vmatprep.subr.mxu0 %v387_v0 }
 0x1c6   :  { %371 = vmatpush3.msra.mxu0 %v233_v39 }
 0x1c7   :  { %373 = vmatmul.mubr.msk.f32.vlgmr.msra.gmra.mrb[6].mxu0 %vm141_vm2, %v234_v40 }
 0x29a   :  { %v310_v42 = vpop.f32.mrb[6].mxu0 }
 0x29b   :  { %v311_v43 = vadd.f32 %v310_v42, %v239_v41  ;;  %v374_v44 = vpop.f32.mrb[7].mxu0 }
 0x29d   :  { %314 = vst [vmem:[%s492_s6] sm:$0xf] %v311_v43 }

</bundles_post_ra>
